<compile_context>
chip_gen: v7x
topology: tpu7x:2x2x1
jax: 0.10.0
libtpu: 0.0.40
codegen_flags: <defaults>
</compile_context>

<pallas_src>
import functools

import jax
import jax.numpy as jnp
from jax.experimental import pallas as pl
from jax.experimental.pallas import tpu as pltpu

# AdaFace hyper-parameters / buffer inits (as in the nn.Module __init__).
M_MARGIN = 0.4
H_SCALER = 0.333
S_SCALE = 64.0
NORM_MEAN_INIT = 20.0   # registered buffer 'norm_mean'
NORM_STD_INIT = 100.0   # registered buffer 'norm_std'
LERP_W = 0.01


def _adaface_kernel(state_ref, norms_ref, labels_ref, logits_ref, loss_ref,
                    m_scr, l_scr, pos_scr, *, m, h, s):
    """Grid = (batch_tiles [parallel], class_tiles [arbitrary])."""
    c = pl.program_id(1)
    num_c = pl.num_programs(1)
    tb, tc = logits_ref.shape

    @pl.when(c == 0)
    def _init():
        m_scr[...] = jnp.full_like(m_scr, -jnp.inf)
        l_scr[...] = jnp.zeros_like(l_scr)
        pos_scr[...] = jnp.zeros_like(pos_scr)

    # ---------------- hot loop: one streaming pass over s * logits ----------
    x = logits_ref[...].astype(jnp.float32) * s                     # (tb, tc)

    # One-hot of the target column inside this class tile: (1, tc) lane iota
    # offset by the tile's class base, broadcast-compared against labels.
    col = jax.lax.broadcasted_iota(jnp.int32, (1, tc), 1) + c * tc
    onehot = col == labels_ref[...]                                  # (tb, tc)

    # Gather the (scaled) positive logit -- non-zero in exactly one class tile.
    # TODO(synk): labels are assumed to lie in [0, C); like the reference
    # gather, there is no ignore_index / padding-label handling.
    pos_scr[...] += jnp.sum(jnp.where(onehot, x, 0.0), axis=1, keepdims=True)

    # Online logsumexp over the original s*logits row.
    m_prev = m_scr[...]
    m_new = jnp.maximum(m_prev, jnp.max(x, axis=1, keepdims=True))
    l_scr[...] = (l_scr[...] * jnp.exp(m_prev - m_new)
                  + jnp.sum(jnp.exp(x - m_new), axis=1, keepdims=True))
    m_scr[...] = m_new

    # -------- finalize: margin math + analytic logsumexp correction ---------
    @pl.when(c == num_c - 1)
    def _finalize():
        norm_mean = state_ref[0]      # already lerp-updated buffer values
        norm_std = state_ref[1]
        norms = norms_ref[...]        # (tb, 1), already clipped to [1e-3, 100]

        inv_denom = pl.reciprocal(jnp.zeros_like(norms) + (norm_std + 0.001),
                                  approx=True)
        g = jnp.clip((norms - norm_mean) * inv_denom * h, -1.0, 1.0)

        s_pos = pos_scr[...]                       # s * original positive
        p = jnp.clip(s_pos * (1.0 / s), -0.999, 0.999)
        a = m * g
        cos_a = jnp.cos(a)
        sin_a = jnp.sin(a)
        # cos(clip(acos(p) - a, 0, pi)) without acos (see header).
        cos_t = p * cos_a + jnp.sqrt(1.0 - p * p) * sin_a
        cos_t = jnp.where((a > 0.0) & (p > cos_a), 1.0, cos_t)
        cos_t = jnp.where((a < 0.0) & (p < -cos_a), -1.0, cos_t)
        s_new = (cos_t - m * (1.0 + g)) * s        # s * modified positive

        # logsumexp of the modified row:
        #   sum_mod = sum_orig - exp(s*pos) + exp(s*new_pos), stable around M.
        m_i = m_scr[...]
        big = jnp.maximum(m_i, s_new)
        total = (l_scr[...] * jnp.exp(m_i - big)
                 - jnp.exp(s_pos - big) + jnp.exp(s_new - big))
        lse = big + jnp.log(jnp.maximum(total, 1e-30))  # guard vs cancellation
        loss_ref[...] = lse - s_new                 # per-row cross entropy


def _pick_block(dim, target, align):
    """Largest multiple of `align` dividing `dim`, capped at `target`;
    falls back to the full dimension (block == array extent is always legal)."""
    t = min(int(target), int(dim))
    t -= t % align
    while t >= align:
        if dim % t == 0:
            return t
        t -= align
    return int(dim)


def adaface_loss(logits, norms, labels, *, m=M_MARGIN, h=H_SCALER, s=S_SCALE,
                 norm_mean=NORM_MEAN_INIT, norm_std=NORM_STD_INIT,
                 block_b=None, block_c=None):
    """AdaFace forward.

    logits: (B, C) cosine logits (any float dtype, kept native in HBM).
    norms:  (B,) feature norms.   labels: (B,) int class ids in [0, C).
    norm_mean / norm_std: current running-buffer values (defaults = __init__).
    Returns (scalar loss, updated norm_mean, updated norm_std).
    """
    B, C = logits.shape

    # -------- O(B) scalar bookkeeping (the nn.Module buffer semantics) ------
    norms_c = jnp.clip(norms.reshape(B).astype(jnp.float32), 0.001, 100.0)
    mean = jnp.sum(norms_c) / B
    # torch.std_mean -> unbiased (ddof=1) std; guarded for B == 1 (torch
    # would produce NaN there).
    var = jnp.sum((norms_c - mean) ** 2) / jnp.maximum(B - 1, 1)
    std = jnp.sqrt(var)
    nm = jnp.asarray(norm_mean, jnp.float32)
    ns = jnp.asarray(norm_std, jnp.float32)
    new_mean = nm + LERP_W * (mean - nm)          # buffer.lerp_(mean, 0.01)
    new_std = ns + LERP_W * (std - ns)            # buffer.lerp_(std, 0.01)
    state = jnp.stack([new_mean, new_std])        # (2,) f32, read from SMEM

    # ------------------------------ tiling ----------------------------------
    if block_b is None:
        block_b = 128
    if block_c is None:
        try:
            kind = jax.devices()[0].device_kind.lower()
        except Exception:
            kind = ""
        # Bigger class tiles on the 128-MiB-VMEM generations (v5e/v6e);
        # stay conservative on v7x (64 MiB physical VMEM) and unknown chips.
        block_c = 2048 if ("v5" in kind or "v6" in kind) else 1024
    tb = _pick_block(B, block_b, 8)
    tc = _pick_block(C, block_c, 128)

    norms_col = norms_c.reshape(B, 1)
    labels_col = labels.reshape(B, 1).astype(jnp.int32)

    itemsize = jnp.dtype(logits.dtype).itemsize
    est = 2 * tb * tc * itemsize + 6 * tb * tc * 4 + (1 << 20)
    vmem_limit = int(min(max(est, 16 << 20), 64 << 20))

    per_row = pl.pallas_call(
        functools.partial(_adaface_kernel, m=float(m), h=float(h), s=float(s)),
        out_shape=jax.ShapeDtypeStruct((B, 1), jnp.float32),
        grid_spec=pltpu.PrefetchScalarGridSpec(
            num_scalar_prefetch=0,
            grid=(B // tb, C // tc),
            in_specs=[
                pl.BlockSpec(memory_space=pltpu.MemorySpace.SMEM),   # buffers
                pl.BlockSpec((tb, 1), lambda b, c: (b, 0)),          # norms
                pl.BlockSpec((tb, 1), lambda b, c: (b, 0)),          # labels
                pl.BlockSpec((tb, tc), lambda b, c: (b, c)),         # logits
            ],
            out_specs=pl.BlockSpec((tb, 1), lambda b, c: (b, 0)),
            scratch_shapes=[pltpu.VMEM((tb, 1), jnp.float32)] * 3,
        ),
        compiler_params=pltpu.CompilerParams(
            dimension_semantics=("parallel", "arbitrary"),
            vmem_limit_bytes=vmem_limit),
    )(state, norms_col, labels_col, logits)

    loss = jnp.sum(per_row) / B                   # mean reduction
    return loss, new_mean, new_std


def _reference(logits, norms, labels, m, h, s, norm_mean, norm_std):
    """Pure-JAX port of the PyTorch module (for a sanity check only)."""
    lf = logits.astype(jnp.float32)
    n = jnp.clip(norms.astype(jnp.float32), 0.001, 100.0)
    mean = jnp.mean(n)
    std = jnp.sqrt(jnp.sum((n - mean) ** 2) / (n.shape[0] - 1))
    nm = norm_mean + LERP_W * (mean - norm_mean)
    ns = norm_std + LERP_W * (std - norm_std)
    g = jnp.clip((n - nm) / (ns + 0.001) * h, -1.0, 1.0)
    rows = jnp.arange(lf.shape[0])
    pos = lf[rows, labels]
    theta = jnp.arccos(jnp.clip(pos, -0.999, 0.999)) - m * g
    new_pos = jnp.cos(jnp.clip(theta, 0.0, jnp.pi)) - m * (1.0 + g)
    mod = lf.at[rows, labels].set(new_pos) * s
    row_max = jnp.max(mod, axis=1)
    lse = row_max + jnp.log(jnp.sum(jnp.exp(mod - row_max[:, None]), axis=1))
    tgt = mod[rows, labels]
    return jnp.mean(lse - tgt)


if __name__ == "__main__":
    B, C = 16, 1024
    key = jax.random.PRNGKey(0)
    k1, k2, k3 = jax.random.split(key, 3)

    # Cosine-similarity-like logits kept in bf16 end-to-end (native dtype),
    # feature norms, class labels.
    logits = jax.random.uniform(k1, (B, C), jnp.float32,
                                minval=-1.0, maxval=1.0).astype(jnp.bfloat16)
    norms = jax.random.uniform(k2, (B,), jnp.float32, minval=5.0, maxval=40.0)
    labels = jax.random.randint(k3, (B,), 0, C, jnp.int32)

    # Small blocks so the demo exercises both grid axes and the online LSE.
    loss, new_mean, new_std = adaface_loss(logits, norms, labels,
                                           block_b=8, block_c=256)
    jax.block_until_ready((loss, new_mean, new_std))

    ref = _reference(logits, norms, labels, M_MARGIN, H_SCALER, S_SCALE,
                     NORM_MEAN_INIT, NORM_STD_INIT)
    assert loss.shape == () and bool(jnp.isfinite(loss))
    assert abs(float(loss) - float(ref)) <= 1e-2 + 2e-2 * abs(float(ref))
    print("KERNEL_OK")
</pallas_src>

<mosaic_0001>
module attributes {stable_mosaic.version = 11 : i64} {
  func.func @_adaface_kernel(%arg0: i32, %arg1: i32, %arg2: memref<2xf32, #tpu.memory_space<smem>>, %arg3: memref<8x1xf32, #tpu.memory_space<vmem>>, %arg4: memref<8x1xi32, #tpu.memory_space<vmem>>, %arg5: memref<8x256xbf16, #tpu.memory_space<vmem>>, %arg6: memref<8x1xf32, #tpu.memory_space<vmem>>, %arg7: memref<8x1xf32, #tpu.memory_space<vmem>>, %arg8: memref<8x1xf32, #tpu.memory_space<vmem>>, %arg9: memref<8x1xf32, #tpu.memory_space<vmem>>) attributes {dimension_semantics = [#tpu.dimension_semantics<parallel>, #tpu.dimension_semantics<arbitrary>], iteration_bounds = array<i64: 2, 4>, scalar_prefetch = 0 : i64, scratch_operands = 3 : i64, tpu.core_type = #tpu.core_type<tc>, window_params = [{transform_indices = @transform_0, window_bounds = array<i64: 2>}, {transform_indices = @transform_1, window_bounds = array<i64: 8, 1>}, {transform_indices = @transform_2, window_bounds = array<i64: 8, 1>}, {transform_indices = @transform_3, window_bounds = array<i64: 8, 256>}, {transform_indices = @transform_4, window_bounds = array<i64: 8, 1>}]} {
    %c0_i32 = arith.constant 0 : i32
    %0 = arith.cmpi eq, %arg1, %c0_i32 : i32
    %1 = arith.extui %0 : i1 to i32
    %c0_i32_0 = arith.constant 0 : i32
    %2 = arith.cmpi ne, %1, %c0_i32_0 : i32
    scf.if %2 {
      %cst_21 = arith.constant 0xFF800000 : f32
      %41 = vector.broadcast %cst_21 : f32 to vector<8x1xf32>
      %c0_22 = arith.constant 0 : index
      %c0_23 = arith.constant 0 : index
      %42 = vector.load %arg7[%c0_22, %c0_23] : memref<8x1xf32, #tpu.memory_space<vmem>>, vector<8x1xf32>
      tpu.vector_store %arg7[%c0_22, %c0_23], %41 {strides = array<i32>} : memref<8x1xf32, #tpu.memory_space<vmem>>, vector<8x1xf32>,
      %cst_24 = arith.constant 0.000000e+00 : f32
      %43 = vector.broadcast %cst_24 : f32 to vector<8x1xf32>
      %c0_25 = arith.constant 0 : index
      %c0_26 = arith.constant 0 : index
      %44 = vector.load %arg8[%c0_25, %c0_26] : memref<8x1xf32, #tpu.memory_space<vmem>>, vector<8x1xf32>
      tpu.vector_store %arg8[%c0_25, %c0_26], %43 {strides = array<i32>} : memref<8x1xf32, #tpu.memory_space<vmem>>, vector<8x1xf32>,
      %cst_27 = arith.constant 0.000000e+00 : f32
      %45 = vector.broadcast %cst_27 : f32 to vector<8x1xf32>
      %c0_28 = arith.constant 0 : index
      %c0_29 = arith.constant 0 : index
      %46 = vector.load %arg9[%c0_28, %c0_29] : memref<8x1xf32, #tpu.memory_space<vmem>>, vector<8x1xf32>
      tpu.vector_store %arg9[%c0_28, %c0_29], %45 {strides = array<i32>} : memref<8x1xf32, #tpu.memory_space<vmem>>, vector<8x1xf32>,
    } else {
    }
    %c0 = arith.constant 0 : index
    %c0_1 = arith.constant 0 : index
    %3 = vector.load %arg5[%c0, %c0_1] : memref<8x256xbf16, #tpu.memory_space<vmem>>, vector<8x256xbf16>
    %4 = arith.extf %3 : vector<8x256xbf16> to vector<8x256xf32>
    %cst = arith.constant 6.400000e+01 : f32
    %5 = vector.broadcast %cst : f32 to vector<8x256xf32>
    %6 = arith.mulf %4, %5 : vector<8x256xf32>
    %7 = tpu.iota {dimensions = array<i32: 1>} : vector<1x256xi32>
    %c256_i32 = arith.constant 256 : i32
    %8 = arith.muli %arg1, %c256_i32 : i32
    %9 = vector.broadcast %8 : i32 to vector<1x256xi32>
    %10 = arith.addi %7, %9 : vector<1x256xi32>
    %c0_2 = arith.constant 0 : index
    %c0_3 = arith.constant 0 : index
    %11 = vector.load %arg4[%c0_2, %c0_3] : memref<8x1xi32, #tpu.memory_space<vmem>>, vector<8x1xi32>
    %12 = vector.broadcast %10 : vector<1x256xi32> to vector<8x256xi32>
    %13 = vector.broadcast %11 : vector<8x1xi32> to vector<8x256xi32>
    %14 = arith.cmpi eq, %12, %13 : vector<8x256xi32>
    %c0_4 = arith.constant 0 : index
    %c0_5 = arith.constant 0 : index
    %15 = vector.load %arg9[%c0_4, %c0_5] : memref<8x1xf32, #tpu.memory_space<vmem>>, vector<8x1xf32>
    %cst_6 = arith.constant 0.000000e+00 : f32
    %16 = vector.broadcast %cst_6 : f32 to vector<8x256xf32>
    %17 = arith.select %14, %6, %16 : vector<8x256xi1>, vector<8x256xf32>
    %cst_7 = arith.constant dense<0.000000e+00> : vector<8xf32>
    %18 = vector.multi_reduction <add>, %17, %cst_7 [1] : vector<8x256xf32> to vector<8xf32>
    %19 = vector.shape_cast %18 : vector<8xf32> to vector<8x1xf32>
    %20 = arith.addf %15, %19 : vector<8x1xf32>
    %c0_8 = arith.constant 0 : index
    %c0_9 = arith.constant 0 : index
    %21 = vector.load %arg9[%c0_8, %c0_9] : memref<8x1xf32, #tpu.memory_space<vmem>>, vector<8x1xf32>
    tpu.vector_store %arg9[%c0_8, %c0_9], %20 {strides = array<i32>} : memref<8x1xf32, #tpu.memory_space<vmem>>, vector<8x1xf32>,
    %c0_10 = arith.constant 0 : index
    %c0_11 = arith.constant 0 : index
    %22 = vector.load %arg7[%c0_10, %c0_11] : memref<8x1xf32, #tpu.memory_space<vmem>>, vector<8x1xf32>
    %cst_12 = arith.constant dense<0xFF800000> : vector<8xf32>
    %23 = vector.multi_reduction <maximumf>, %6, %cst_12 [1] : vector<8x256xf32> to vector<8xf32>
    %24 = vector.shape_cast %23 : vector<8xf32> to vector<8x1xf32>
    %25 = arith.maximumf %22, %24 : vector<8x1xf32>
    %c0_13 = arith.constant 0 : index
    %c0_14 = arith.constant 0 : index
    %26 = vector.load %arg8[%c0_13, %c0_14] : memref<8x1xf32, #tpu.memory_space<vmem>>, vector<8x1xf32>
    %27 = arith.subf %22, %25 : vector<8x1xf32>
    %28 = math.exp %27 : vector<8x1xf32>
    %29 = arith.mulf %26, %28 : vector<8x1xf32>
    %30 = vector.broadcast %25 : vector<8x1xf32> to vector<8x256xf32>
    %31 = arith.subf %6, %30 : vector<8x256xf32>
    %32 = math.exp %31 : vector<8x256xf32>
    %cst_15 = arith.constant dense<0.000000e+00> : vector<8xf32>
    %33 = vector.multi_reduction <add>, %32, %cst_15 [1] : vector<8x256xf32> to vector<8xf32>
    %34 = vector.shape_cast %33 : vector<8xf32> to vector<8x1xf32>
    %35 = arith.addf %29, %34 : vector<8x1xf32>
    %c0_16 = arith.constant 0 : index
    %c0_17 = arith.constant 0 : index
    %36 = vector.load %arg8[%c0_16, %c0_17] : memref<8x1xf32, #tpu.memory_space<vmem>>, vector<8x1xf32>
    tpu.vector_store %arg8[%c0_16, %c0_17], %35 {strides = array<i32>} : memref<8x1xf32, #tpu.memory_space<vmem>>, vector<8x1xf32>,
    %c0_18 = arith.constant 0 : index
    %c0_19 = arith.constant 0 : index
    %37 = vector.load %arg7[%c0_18, %c0_19] : memref<8x1xf32, #tpu.memory_space<vmem>>, vector<8x1xf32>
    tpu.vector_store %arg7[%c0_18, %c0_19], %25 {strides = array<i32>} : memref<8x1xf32, #tpu.memory_space<vmem>>, vector<8x1xf32>,
    %c3_i32 = arith.constant 3 : i32
    %38 = arith.cmpi eq, %arg1, %c3_i32 : i32
    %39 = arith.extui %38 : i1 to i32
    %c0_i32_20 = arith.constant 0 : i32
    %40 = arith.cmpi ne, %39, %c0_i32_20 : i32
    scf.if %40 {
      %c0_21 = arith.constant 0 : index
      %41 = memref.load %arg2[%c0_21] : memref<2xf32, #tpu.memory_space<smem>>
      %c1 = arith.constant 1 : index
      %42 = memref.load %arg2[%c1] : memref<2xf32, #tpu.memory_space<smem>>
      %c0_22 = arith.constant 0 : index
      %c0_23 = arith.constant 0 : index
      %43 = vector.load %arg3[%c0_22, %c0_23] : memref<8x1xf32, #tpu.memory_space<vmem>>, vector<8x1xf32>
      %cst_24 = arith.constant 0.000000e+00 : f32
      %44 = vector.broadcast %cst_24 : f32 to vector<8x1xf32>
      %cst_25 = arith.constant 1.000000e-03 : f32
      %45 = arith.addf %42, %cst_25 : f32
      %46 = vector.broadcast %45 : f32 to vector<8x1xf32>
      %47 = arith.addf %44, %46 : vector<8x1xf32>
      %48 = tpu.reciprocal %47 {approx = true} : vector<8x1xf32> -> vector<8x1xf32>
      %49 = vector.broadcast %41 : f32 to vector<8x1xf32>
      %50 = arith.subf %43, %49 : vector<8x1xf32>
      %51 = arith.mulf %50, %48 : vector<8x1xf32>
      %cst_26 = arith.constant 3.330000e-01 : f32
      %52 = vector.broadcast %cst_26 : f32 to vector<8x1xf32>
      %53 = arith.mulf %51, %52 : vector<8x1xf32>
      %cst_27 = arith.constant -1.000000e+00 : f32
      %cst_28 = arith.constant 1.000000e+00 : f32
      %54 = vector.broadcast %cst_27 : f32 to vector<8x1xf32>
      %55 = arith.maximumf %54, %53 : vector<8x1xf32>
      %56 = vector.broadcast %cst_28 : f32 to vector<8x1xf32>
      %57 = arith.minimumf %56, %55 : vector<8x1xf32>
      %c0_29 = arith.constant 0 : index
      %c0_30 = arith.constant 0 : index
      %58 = vector.load %arg9[%c0_29, %c0_30] : memref<8x1xf32, #tpu.memory_space<vmem>>, vector<8x1xf32>
      %cst_31 = arith.constant 1.562500e-02 : f32
      %59 = vector.broadcast %cst_31 : f32 to vector<8x1xf32>
      %60 = arith.mulf %58, %59 : vector<8x1xf32>
      %cst_32 = arith.constant -9.990000e-01 : f32
      %cst_33 = arith.constant 9.990000e-01 : f32
      %61 = vector.broadcast %cst_32 : f32 to vector<8x1xf32>
      %62 = arith.maximumf %61, %60 : vector<8x1xf32>
      %63 = vector.broadcast %cst_33 : f32 to vector<8x1xf32>
      %64 = arith.minimumf %63, %62 : vector<8x1xf32>
      %cst_34 = arith.constant 4.000000e-01 : f32
      %65 = vector.broadcast %cst_34 : f32 to vector<8x1xf32>
      %66 = arith.mulf %65, %57 : vector<8x1xf32>
      %67 = math.cos %66 : vector<8x1xf32>
      %68 = math.sin %66 : vector<8x1xf32>
      %69 = arith.mulf %64, %67 : vector<8x1xf32>
      %70 = arith.mulf %64, %64 : vector<8x1xf32>
      %cst_35 = arith.constant 1.000000e+00 : f32
      %71 = vector.broadcast %cst_35 : f32 to vector<8x1xf32>
      %72 = arith.subf %71, %70 : vector<8x1xf32>
      %73 = math.sqrt %72 : vector<8x1xf32>
      %74 = arith.mulf %73, %68 : vector<8x1xf32>
      %75 = arith.addf %69, %74 : vector<8x1xf32>
      %cst_36 = arith.constant 0.000000e+00 : f32
      %76 = vector.broadcast %cst_36 : f32 to vector<8x1xf32>
      %77 = arith.cmpf ogt, %66, %76 : vector<8x1xf32>
      %78 = arith.cmpf ogt, %64, %67 : vector<8x1xf32>
      %79 = arith.andi %77, %78 : vector<8x1xi1>
      %cst_37 = arith.constant 1.000000e+00 : f32
      %80 = vector.broadcast %cst_37 : f32 to vector<8x1xf32>
      %81 = arith.select %79, %80, %75 : vector<8x1xi1>, vector<8x1xf32>
      %cst_38 = arith.constant 0.000000e+00 : f32
      %82 = vector.broadcast %cst_38 : f32 to vector<8x1xf32>
      %83 = arith.cmpf olt, %66, %82 : vector<8x1xf32>
      %cst_39 = arith.constant 0.000000e+00 : f32
      %84 = vector.broadcast %cst_39 : f32 to vector<8x1xf32>
      %85 = arith.subf %84, %67 : vector<8x1xf32>
      %86 = arith.cmpf olt, %64, %85 : vector<8x1xf32>
      %87 = arith.andi %83, %86 : vector<8x1xi1>
      %cst_40 = arith.constant -1.000000e+00 : f32
      %88 = vector.broadcast %cst_40 : f32 to vector<8x1xf32>
      %89 = arith.select %87, %88, %81 : vector<8x1xi1>, vector<8x1xf32>
      %cst_41 = arith.constant 1.000000e+00 : f32
      %90 = vector.broadcast %cst_41 : f32 to vector<8x1xf32>
      %91 = arith.addf %90, %57 : vector<8x1xf32>
      %cst_42 = arith.constant 4.000000e-01 : f32
      %92 = vector.broadcast %cst_42 : f32 to vector<8x1xf32>
      %93 = arith.mulf %92, %91 : vector<8x1xf32>
      %94 = arith.subf %89, %93 : vector<8x1xf32>
      %cst_43 = arith.constant 6.400000e+01 : f32
      %95 = vector.broadcast %cst_43 : f32 to vector<8x1xf32>
      %96 = arith.mulf %94, %95 : vector<8x1xf32>
      %c0_44 = arith.constant 0 : index
      %c0_45 = arith.constant 0 : index
      %97 = vector.load %arg7[%c0_44, %c0_45] : memref<8x1xf32, #tpu.memory_space<vmem>>, vector<8x1xf32>
      %98 = arith.maximumf %97, %96 : vector<8x1xf32>
      %c0_46 = arith.constant 0 : index
      %c0_47 = arith.constant 0 : index
      %99 = vector.load %arg8[%c0_46, %c0_47] : memref<8x1xf32, #tpu.memory_space<vmem>>, vector<8x1xf32>
      %100 = arith.subf %97, %98 : vector<8x1xf32>
      %101 = math.exp %100 : vector<8x1xf32>
      %102 = arith.mulf %99, %101 : vector<8x1xf32>
      %103 = arith.subf %58, %98 : vector<8x1xf32>
      %104 = math.exp %103 : vector<8x1xf32>
      %105 = arith.subf %102, %104 : vector<8x1xf32>
      %106 = arith.subf %96, %98 : vector<8x1xf32>
      %107 = math.exp %106 : vector<8x1xf32>
      %108 = arith.addf %105, %107 : vector<8x1xf32>
      %cst_48 = arith.constant 1.000000e-30 : f32
      %109 = vector.broadcast %cst_48 : f32 to vector<8x1xf32>
      %110 = arith.maximumf %108, %109 : vector<8x1xf32>
      %111 = math.log %110 : vector<8x1xf32>
      %112 = arith.addf %98, %111 : vector<8x1xf32>
      %113 = arith.subf %112, %96 : vector<8x1xf32>
      %c0_49 = arith.constant 0 : index
      %c0_50 = arith.constant 0 : index
      %114 = vector.load %arg6[%c0_49, %c0_50] : memref<8x1xf32, #tpu.memory_space<vmem>>, vector<8x1xf32>
      tpu.vector_store %arg6[%c0_49, %c0_50], %113 {strides = array<i32>} : memref<8x1xf32, #tpu.memory_space<vmem>>, vector<8x1xf32>,
    } else {
    }
    return
  }
  func.func @transform_0(%arg0: i32, %arg1: i32) -> i32 {
    %c0_i32 = arith.constant 0 : i32
    %c0_i32_0 = arith.constant 0 : i32
    return %c0_i32 : i32
  }
  func.func @transform_1(%arg0: i32, %arg1: i32) -> (i32, i32) {
    %c0_i32 = arith.constant 0 : i32
    %c0_i32_0 = arith.constant 0 : i32
    return %arg0, %c0_i32 : i32, i32
  }
  func.func @transform_2(%arg0: i32, %arg1: i32) -> (i32, i32) {
    %c0_i32 = arith.constant 0 : i32
    %c0_i32_0 = arith.constant 0 : i32
    return %arg0, %c0_i32 : i32, i32
  }
  func.func @transform_3(%arg0: i32, %arg1: i32) -> (i32, i32) {
    %c0_i32 = arith.constant 0 : i32
    return %arg0, %arg1 : i32, i32
  }
  func.func @transform_4(%arg0: i32, %arg1: i32) -> (i32, i32) {
    %c0_i32 = arith.constant 0 : i32
    %c0_i32_0 = arith.constant 0 : i32
    return %arg0, %c0_i32 : i32, i32
  }
}

</mosaic_0001>

<bundles_post_ra>
// kernel: tpu_custom_call.1
= control target key start
LH: loop header
LB: loop body
LE: loop exit
PB: predicated region body
PF: predicated region fallthrough
CT: control target
= control target key end

     0   :  { %s1272_s0 = inlined_call_operand.vmem [shape: f32[2], index: 0, kind: input, shape index: {}]   ;;  %s1273_s1 = inlined_call_operand.vmem [shape: f32[16,1], index: 1, kind: input, shape index: {}]   ;;  %s1274_s2 = inlined_call_operand.vmem [shape: s32[16,1], index: 2, kind: input, shape index: {}]   ;;  %s1275_s3 = inlined_call_operand.hbm [shape: bf16[16,1024], index: 3, kind: input, shape index: {}]   ;;  %s1276_s4 = inlined_call_operand.vmem [shape: f32[16,1], index: 4, kind: output, shape index: {}]  }
   0x1   :  { %1282 = sst [smem:[#allocation13_spill]] %s1272_s0 }
   0x2   :  { %9 = vsyncpa [#allocation7], 0 }
   0x3   :  { %10 = vsyncpa [#allocation6], 0 }
   0x4   :  { %12 = vsyncpa [#allocation6 + $0x1], 0  ;;  %s1034_s15 = smov 0   ;;  %s1036_s16 = smov 0  }
   0x5   :  { %s1038_s17 = smov 0   ;;  %s1040_s18 = smov 0  }
   0x6   :  { %s1042_s19 = smov 0   ;;  %s1044_s20 = smov 0  }
   0x7   :  { %s1046_s21 = smov 0   ;;  %s1048_s22 = smov 0  }
   0x8 LB: > { %1283 = sst [smem:[#allocation11_spill]] %s980_s18  ;;  %s731_s23 = sadd.s32 4294967295, %s996_s22   ;;  %s996_s22 = sphi %s1048_s22, %s18_s22   ;;  %s992_s21 = sphi %s1046_s21, %s1302_s21   ;;  %s988_s20 = sphi %s1044_s20, %s1301_s20   ;;  %s984_s19 = sphi %s1042_s19, %s1300_s19   ;;  %s980_s18 = sphi %s1040_s18, %s1299_s18   ;;  %s976_s17 = sphi %s1038_s17, %s1298_s17   ;;  %s972_s16 = sphi %s1036_s16, %s1297_s16   ;;  %s968_s15 = sphi %s1034_s15, %s1296_s15  }
   0x9   : > { %p125_p0 = scmp.ne.s32.totalorder %s972_s16, %s968_s15  ;;  %p1074_p1 = scmp.eq.s32.totalorder %s731_s23, 0 }
   0xa   : > { %p733_p2 = scmp.ge.s32.totalorder %s996_s22, 1  ;;  %p162_p3 = scmp.lt.s32.totalorder %s996_s22, 9 }
   0xb   : > { %s1284_s24 = scalar_select %p1074_p1, 1, 0 }
   0xc   : > { %p1082_p4 = por %p1074_p1, %p125_p0  ;;  %s1286_s0 = sld [smem:[#allocation13_spill]] }
   0xd   : > { %p1089_p5 = pnand %p733_p2, %p162_p3  ;;  %s27_s30 = sadd.s32 1, %s988_s20 }
   0xe   : > { %s1285_s25 = scalar_select %p1082_p4, 1, 0 }
   0xf   : > { %p772_p6 = pneg %p1089_p5 }
  0x11   : > { %p773_p7 = pnand %p772_p6, %p1074_p1 }
  0x12   : > { %s175_s28 = sshll.u32 %s1286_s0, 4  ;;  %s176_s28 = int_to_ptr.vmem [resolvable:$true] %s175_s28 }
  0x13   : > { %s881_s5 = scalar_lea.vmem %s176_s28, 16  ;;  %p883_p9 = pneg %p773_p7 }
  0x14   : > { %p882_p8 = scmp.ne.s32.totalorder %s176_s28, %s881_s5  ;;  %p889_p12 = scmp.lt.s32.totalorder %s176_s28, %s176_s28 }
  0x15   : > { %p890_p13 = scmp.lt.s32.totalorder %s881_s5, %s881_s5 }
  0x16   : > { %p884_p10 = pnand %p883_p9, %p882_p8 }
  0x17   : > { %p891_p0 = por %p890_p13, %p889_p12 }
  0x18   : > { %p885_p11 = pneg %p884_p10 }
  0x1a   : > { %p892_p4 = pnand %p891_p0, %p885_p11 }
  0x1c   : > { %895 = shalt.err (!%p892_p4)
}
  0x1d   : > { %s998_s6 = smov [#allocation5]   ;;  %p28_p2 = scmp.ge.s32.totalorder %s27_s30, 4 }
  0x1e   : > { %775 = dma.vmem_to_smem (!%p773_p7), %s176_s28, 16, %s998_s6, [#allocation7]  }
  0x1f   : > { %s30_s7 = sadd.s32 1, %s992_s21  ;;  %s112_s8 = sadd.s32 1, %s976_s17 }
  0x20   : > { %p119_p3 = scmp.ne.s32.totalorder %s976_s17, %s972_s16  ;;  %s1304_s30 = smov (%p28_p2, %s27_s30), 0 }
  0x21   : > { %1288 = sst [smem:[#allocation12_spill]] %s1304_s30  ;;  %s1306_s7 = smov (!%p28_p2, %s30_s7), %s992_s21 }
  0x22   : > { %s108_s9 = ssub.s32 %s988_s20, %s1304_s30  ;;  %p120_p4 = scmp.eq.s32.totalorder %s996_s22, 0 }
  0x23   : > { %p32_p6 = scmp.ge.s32.totalorder %s1306_s7, 2  ;;  %p781_p8 = scmp.lt.s32.totalorder %s996_s22, 8 }
  0x24   : > { %p1109_p9 = por %p120_p4, %p119_p3  ;;  %s200_s11 = sand.u32 1, %s976_s17  }
  0x25   : > { %s1308_s7 = smov (%p32_p6, %s1306_s7), 0  ;;  %s736_s12 = sshll.u32 %s200_s11, 3 }
  0x26   : > { %s107_s13 = ssub.s32 %s992_s21, %s1308_s7  ;;  %s737_s15 = sshll.u32 %s988_s20, 1 }
  0x27   : > { %s109_s14 = sor.u32 %s108_s9, %s107_s13  ;;  %s738_s23 = sshll.u32 %s992_s21, 3 }
  0x28   : > { %p110_p7 = scmp.eq.s32.totalorder %s109_s14, 0  ;;  %s210_s26 = sadd.s32 %s738_s23, %s737_s15 }
  0x29   : > { %s204_s27 = scalar_lea.vmem [#allocation8], %s736_s12  ;;  %s739_s6 = sshll.u32 %s210_s26, 6 }
  0x2a   : > { %s214_s28 = sshll.u32 %s204_s27, 4  ;;  %s1128_s18 = scalar_lea.hbm %s1275_s3, %s739_s6  ;;  %s1123_s28 = int_to_ptr.vmem [resolvable:$true] %s214_s28 }
  0x2b   : > { %s1121_s5 = scalar_select %p110_p7, %s976_s17, %s112_s8  }
  0x2c   : > { %p1134_p10 = pnand %p781_p8, %p1109_p9  ;;  %s201_s8 = scalar_lea.sflag [#allocation6], %s200_s11 }
  0x2d   : > { %s896_s12 = scalar_lea.hbm %s1128_s18, 128  ;;  %s901_s10 = scalar_lea.hbm %s1275_s3, 1024 }
  0x2e   : > { %p897_p11 = scmp.ne.s32.totalorder %s1128_s18, %s896_s12  ;;  %p898_p12 = pneg %p1134_p10 }
  0x2f   : > { %p902_p2 = scmp.lt.u32.totalorder %s1128_s18, %s1275_s3  ;;  %p903_p3 = scmp.lt.u32.totalorder %s901_s10, %s896_s12 }
  0x30   : > { %p899_p13 = pnand %p898_p12, %p897_p11  ;;  %p905_p6 = scmp.lt.u32.totalorder %s896_s12, %s1128_s18 }
  0x31   : > { %p904_p4 = por %p903_p3, %p902_p2 }
  0x32   : > { %p900_p0 = pneg %p899_p13 }
  0x33   : > { %p906_p8 = por %p905_p6, %p904_p4 }
  0x35   : > { %p907_p9 = pnand %p906_p8, %p900_p0 }
  0x37   : > { %910 = shalt.err (!%p907_p9)
}
  0x38   : > { %s911_s11 = scalar_lea.vmem %s1123_s28, 128  ;;  %s999_s15 = smov [#allocation8]  }
  0x39   : > { %p912_p7 = scmp.ne.s32.totalorder %s1123_s28, %s911_s11  ;;  %s916_s23 = sshll.u32 %s999_s15, 4  ;;  %s917_s23 = int_to_ptr.vmem [resolvable:$false] %s916_s23 }
  0x3a   : > { %s918_s26 = scalar_lea.vmem %s917_s23, 256  ;;  %p919_p1 = scmp.lt.s32.totalorder %s1123_s28, %s917_s23 }
  0x3b   : > { %p914_p11 = pnand %p912_p7, %p898_p12  ;;  %p920_p2 = scmp.lt.s32.totalorder %s918_s26, %s911_s11 }
  0x3d   : > { %p915_p13 = pneg %p914_p11  ;;  %p921_p3 = por %p920_p2, %p919_p1 }
  0x3f   : > { %p922_p4 = pnand %p921_p3, %p915_p13 }
  0x41   : > { %925 = shalt.err (!%p922_p4)
}
  0x42   : > { %779 = dma.hbm_to_vmem [thread:$0]  (!%p1134_p10), %s1128_s18, 128, %s1123_s28, %s201_s8  }
  0x43   : > { %223 = sbr.rel (%p1089_p5) target bundleno = 642 (0x282), region = 36  ;;  %p1291_p12 = scmp.ne.s32.totalorder (!%p1089_p5), %s1284_s24, 0 }
  0x4a   : > { %959 = dma.done.wait (%p1291_p12), [#allocation7], 16  }
  0x4b   : > { %961 = vsyncadd (%p1291_p12), [#allocation7], 4294967280  ;;  %s229_s27 = sand.u32 1, %s972_s16   ;;  %p1292_p1 = scmp.ne.s32.totalorder %s1285_s25, 0 }
  0x4c   : > { %s742_s6 = sshll.u32 %s229_s27, 3  ;;  %s230_s12 = scalar_lea.sflag [#allocation6], %s229_s27 }
  0x4d   : > { %s233_s0 = scalar_lea.vmem [#allocation8], %s742_s6 }
  0x4e   : > { %963 = dma.done.wait (%p1292_p1), %s230_s12, 128  }
  0x4f   : > { %965 = vsyncadd (%p1292_p1), %s230_s12, 4294967168 }
  0x50   : > { %238 = sfence }
  0x51   : > { %p266_p5 = scmp.lt.s32.totalorder %s984_s19, 1  ;;  %s1293_s14 = sld [smem:[#allocation11_spill]] }
  0x53   : > { %s1310_s19 = smov (!%p266_p5, %s984_s19), 1 }
  0x54   : > { %s1176_s18 = sshll.u32 %s1310_s19, 3 }
  0x55   : > { %s269_s28 = scalar_lea.vmem %s1273_s1, %s1176_s18  ;;  %s273_s30 = scalar_lea.vmem %s1274_s2, %s1176_s18 }
  0x56   : > { %s278_s13 = scalar_lea.vmem %s1276_s4, %s1176_s18 }
  0x57   : > { %p746_p10 = scmp.ne.s32.totalorder %s1293_s14, 0 }
  0x58   : > { %vm283_vm0 = vcmask (!%p746_p10), 7168   ;;  %v1000_v0 = vmov (!%p746_p10), -inf   ;;  %v1001_v1 = vmov (!%p746_p10), 0.0  }
  0x59   : > { %282 = sbr.rel (%p746_p10) target bundleno = 96 (0x60), region = 48  ;;  %284 = vst.msk [vmem:[#allocation2] sm:$0xff] (!%p746_p10), %vm283_vm0, %v1000_v0  ;;  %285 = vst.msk [vmem:[#allocation3] sm:$0xff] (!%p746_p10), %vm283_vm0, %v1001_v1 }
  0x5a   : > { %286 = vst.msk [vmem:[#allocation4] sm:$0xff] (!%p746_p10), %vm283_vm0, %v1001_v1 }
  0x60 PF: > { %v287_v2 = vld [vmem:[%s233_s0] sm:$0xff]  ;;  %s1294_s19 = sld [smem:[#allocation11_spill]]  ;;  %v1002_v8 = vmov 0   ;;  %vm312_vm1 = vcmask 7168   ;;  %v292_v14 = vlaneseq  ;;  %v319_v37 = vld [vmem:[#allocation3] sm:$0xff] }
  0x61   : > { %v288_v3 = vunpack.c.l.bf16 %v287_v2  ;;  %v289_v4 = vunpack.c.h.bf16 %v287_v2  ;;  %857 = vset.pattern.permute.xlu0 %v1002_v8  ;;  %858 = vset.pattern.permute.xlu1 %v1002_v8  ;;  %v299_v9 = vld [vmem:[%s273_s30] sm:$0xff]  ;;  %v305_v32 = vld [vmem:[#allocation4] sm:$0xff] }
  0x62   : > { %301 = vperm.xlu1 %858, %v299_v9   ;;  %v314_v10 = vld [vmem:[#allocation2] sm:$0xff]  ;;  %v293_v15 = vand.u32 127, %v292_v14 }
  0x63   : > { %v290_v5 = vmul.f32 64.0, %v288_v3  ;;  %v291_v6 = vmul.f32 64.0, %v289_v4 }
  0x64   : > { %v294_v17 = vadd.s32 128, %v293_v15 }
  0x65   : > { %v315_v7 = vmax.f32 %v290_v5, %v291_v6 }
  0x66   : > { %s747_s11 = sshll.u32 %s1294_s19, 8  ;;  %p748_p0 = scmp.ne.s32.totalorder %s1294_s19, 3 }
  0x67   : > { %316 = vmax.xlane.f32.xlu0 %v315_v7  ;;  %v296_v18 = vstv %s747_s11  ;;  %s749_s15 = sld [smem:[#allocation5 + $0x1]] (!%p748_p0)  ;;  %s345_s23 = sld [smem:[#allocation5]] (!%p748_p0)  ;;  %v347_v42 = vld [vmem:[%s269_s28] sm:$0xff] (!%p748_p0)  ;;  %v1003_v61 = vmov (!%p748_p0), 683565275  }
  0x68   : > { %v297_v19 = vadd.s32 %v296_v18, %v293_v15  ;;  %v298_v20 = vadd.s32 %v296_v18, %v294_v17  ;;  %v1004_v63 = vmov (!%p748_p0), 2475754826   ;;  %v1005_v1 = vmov (!%p748_p0), 2131351028  }
  0x69   : > { %v1006_v3 = vmov (!%p748_p0), 2102212464  }
  0x6d   : > { %s348_s26 = sadd.f32 (!%p748_p0), 0.001, %s749_s15  ;;  %v352_v43 = vstv (!%p748_p0), %s345_s23 }
  0x6e   : > { %v353_v44 = vsub.f32 (!%p748_p0), %v347_v42, %v352_v43 }
  0x6f   : > { %v349_v41 = vstv (!%p748_p0), %s348_s26 }
  0xe1   : > { %v302_v16 = vpop.permute.xlu1 %301 }
  0xe2   : > { %vm303_vm2 = vcmp.eq.s32.totalorder %v297_v19, %v302_v16  ;;  %vm304_vm3 = vcmp.eq.s32.totalorder %v298_v20, %v302_v16 }
  0xe3   : > { %v306_v21 = vsel %vm303_vm2, %v290_v5, 0.0  ;;  %v307_v22 = vsel %vm304_vm3, %v291_v6, 0.0 }
  0xe4   : > { %v308_v23 = vadd.f32 %v307_v22, %v306_v21 }
  0xe6   : > { %309 = vadd.xlane.f32.xlu1 %v308_v23 }
  0xf4   : > { %v317_v11 = vpop.xlane.xlu0 %316 }
  0xf5   : > { %v318_v12 = vmax.f32 %v314_v10, %v317_v11 }
  0xf7   : > { %v320_v13 = vsub.f32 %v314_v10, %v318_v12  ;;  %340 = vst.msk [vmem:[#allocation2] sm:$0xff] %vm312_vm1, %v318_v12  ;;  %326 = vperm.xlu0 %857, %v318_v12   ;;  %v1008_v12 = vmov (!%p748_p0), 1326507024  }
  0xf9   : > { %v321_v35 = vmul.f32 1.442695, %v320_v13 }
 0x173   : > { %v310_v33 = vpop.xlane.xlu1 %309 }
 0x174   : > { %v311_v34 = vadd.f32 %v310_v33, %v305_v32 }
 0x176   : > { %v327_v24 = vpop.permute.xlu0 %326  ;;  %313 = vst.msk [vmem:[#allocation4] sm:$0xff] %vm312_vm1, %v311_v34 }
 0x177   : > { %v329_v25 = vsub.f32 %v290_v5, %v327_v24  ;;  %v330_v26 = vsub.f32 %v291_v6, %v327_v24  ;;  %v1007_v5 = vmov (!%p748_p0), 920167782  }
 0x179   : > { %v331_v27 = vmul.f32 1.442695, %v329_v25  ;;  %v333_v28 = vmul.f32 1.442695, %v330_v26 }
 0x17b   : > { %859 = vpow2.f32 %v331_v27 }
 0x17c   : > { %861 = vpow2.f32 %v333_v28 }
 0x17d   : > { %863 = vpow2.f32 %v321_v35 }
 0x17e   : > { %865 = vrcp.f32 (!%p748_p0), %v349_v41 }
 0x185   : > { %v860_v29 = vpop.eup %859 }
 0x186   : > { %v862_v30 = vpop.eup %861 }
 0x187   : > { %v335_v31 = vadd.f32 %v862_v30, %v860_v29  ;;  %v864_v36 = vpop.eup %863 }
 0x188   : > { %v323_v38 = vmul.f32 %v864_v36, %v319_v37  ;;  %v866_v45 = vpop.eup (!%p748_p0), %865 }
 0x189   : > { %336 = vadd.xlane.f32.xlu1 %v335_v31  ;;  %v354_v46 = vmul.f32 (!%p748_p0), %v866_v45, %v353_v44  ;;  %v1221_v45 = vld [vmem:[#allocation4] sm:$0xff] (!%p748_p0) }
 0x18b   : > { %v1201_v47 = vmul.f32 (!%p748_p0), 0.333, %v354_v46 }
 0x18d   : > { %v750_v48 = vclamps-f32 (!%p748_p0), %v1201_v47, 1.0 }
 0x18f   : > { %v1206_v49 = vmul.f32 (!%p748_p0), 0.4, %v750_v48 }
 0x191   : > { %v366_v50 = vand.u32 (!%p748_p0), 2139095040, %v1206_v49  ;;  %v363_v52 = vand.u32 (!%p748_p0), 2147483647, %v1206_v49  ;;  %vm365_vm11 = vcmp.lt.s32.totalorder (!%p748_p0), %v1206_v49, 0 }
 0x193   : > { %v367_v51 = vshrl.u32 (!%p748_p0), %v366_v50, 23  ;;  %v370_v55 = vand.u32 (!%p748_p0), 8388607, %v363_v52  ;;  %v359_v50 = vmul.f32 (!%p748_p0), 0.015625, %v1221_v45  ;;  %vm364_vm12 = vcmp.le.f32.partialorder (!%p748_p0), %v363_v52, 0.7853982 }
 0x195   : > { %v752_v53 = vadd.s32 (!%p748_p0), 4294967169, %v367_v51  ;;  %v371_v58 = vor.u32 (!%p748_p0), 8388608, %v370_v55 }
 0x197   : > { %v373_v54 = vadd.s32 (!%p748_p0), 1, %v752_v53  ;;  %v411_v14 = vshll.u32 (!%p748_p0), %v371_v58, 8 }
 0x199   : > { %vm374_vm4 = vcmp.gt.s32.totalorder (!%p748_p0), %v373_v54, 0 }
 0x19a   : > { %v375_v56 = vsel (!%p748_p0), %vm374_vm4, %v373_v54, 0  ;;  %v1224_v54 = vclamps-f32 (!%p748_p0), %v359_v50, 0.999 }
 0x19b   : > { %v377_v57 = vand.u32 (!%p748_p0), 31, %v375_v56  ;;  %v376_v59 = vshrl.u32 (!%p748_p0), %v375_v56, 5 }
 0x19d   : > { %v378_v60 = vsub.s32 (!%p748_p0), 32, %v377_v57  ;;  %v380_v62 = vshll.u32 (!%p748_p0), %v1003_v61, %v377_v57  ;;  %v383_v0 = vshll.u32 (!%p748_p0), %v1004_v63, %v377_v57  ;;  %v386_v2 = vshll.u32 (!%p748_p0), %v1005_v1, %v377_v57 }
 0x19e   : > { %v389_v4 = vshll.u32 (!%p748_p0), %v1006_v3, %v377_v57  ;;  %v392_v6 = vshll.u32 (!%p748_p0), %v1007_v5, %v377_v57  ;;  %vm395_vm5 = vcmp.lt.s32.totalorder (!%p748_p0), %v376_v59, 1  ;;  %vm398_vm6 = vcmp.lt.s32.totalorder (!%p748_p0), %v376_v59, 4 }
 0x19f   : > { %v379_v7 = vshrl.u32 (!%p748_p0), %v1003_v61, %v378_v60  ;;  %v381_v8 = vshrl.u32 (!%p748_p0), %v1004_v63, %v378_v60  ;;  %v384_v9 = vshrl.u32 (!%p748_p0), %v1005_v1, %v378_v60  ;;  %v387_v10 = vshrl.u32 (!%p748_p0), %v1006_v3, %v378_v60 }
 0x1a0   : > { %v390_v11 = vshrl.u32 (!%p748_p0), %v1007_v5, %v378_v60  ;;  %v393_v13 = vshrl.u32 (!%p748_p0), %v1008_v12, %v378_v60  ;;  %vm396_vm7 = vcmp.lt.s32.totalorder (!%p748_p0), %v376_v59, 2  ;;  %vm397_vm8 = vcmp.lt.s32.totalorder (!%p748_p0), %v376_v59, 3 }
 0x1a1   : > { %v382_v15 = vor.u32 (!%p748_p0), %v381_v8, %v380_v62  ;;  %v385_v16 = vor.u32 (!%p748_p0), %v384_v9, %v383_v0  ;;  %v388_v17 = vor.u32 (!%p748_p0), %v387_v10, %v386_v2  ;;  %v571_v62 = vmul.f32 (!%p748_p0), %v1224_v54, %v1224_v54 }
 0x1a2   : > { %v391_v18 = vor.u32 (!%p748_p0), %v390_v11, %v389_v4  ;;  %v394_v19 = vor.u32 (!%p748_p0), %v393_v13, %v392_v6 }
 0x1a3   : > { %v399_v20 = vsel (!%p748_p0), %vm395_vm5, %v379_v7, %v382_v15  ;;  %v400_v21 = vsel (!%p748_p0), %vm398_vm6, %v388_v17, 2102212464  ;;  %v403_v22 = vsel (!%p748_p0), %vm395_vm5, %v382_v15, %v385_v16  ;;  %v407_v23 = vsel (!%p748_p0), %vm395_vm5, %v385_v16, %v388_v17 }
 0x1a4   : > { %v401_v24 = vsel (!%p748_p0), %vm397_vm8, %v385_v16, %v400_v21  ;;  %v404_v25 = vsel (!%p748_p0), %vm398_vm6, %v391_v18, 920167782  ;;  %v408_v26 = vsel (!%p748_p0), %vm398_vm6, %v394_v19, 1326507024  ;;  %v572_v3 = vsub.f32 (!%p748_p0), 1.0, %v571_v62 }
 0x1a5   : > { %v405_v27 = vsel (!%p748_p0), %vm397_vm8, %v388_v17, %v404_v25  ;;  %v409_v28 = vsel (!%p748_p0), %vm397_vm8, %v391_v18, %v408_v26  ;;  %v402_v29 = vsel (!%p748_p0), %vm396_vm7, %v399_v20, %v401_v24  ;;  %vm455_vm6 = vweird.f32 (!%p748_p0), %v1206_v49 }
 0x1a6   : > { %v406_v30 = vsel (!%p748_p0), %vm396_vm7, %v403_v22, %v405_v27  ;;  %v410_v31 = vsel (!%p748_p0), %vm396_vm7, %v407_v23, %v409_v28  ;;  %v418_v36 = vmul.u32 (!%p748_p0), %v411_v14, %v402_v29  ;;  %867 = vrsqrt.f32 (!%p748_p0), %v572_v3 }
 0x1a7   : > { %v1212_v32 = vmul.u32.u64.low (!%p748_p0), %v411_v14, %v410_v31  ;;  %v1213_v33 = vmul.u32.u64.high %v411_v14, %v410_v31, %v1212_v32  ;;  %v1215_v34 = vmul.u32.u64.low (!%p748_p0), %v411_v14, %v406_v30  ;;  %v1216_v35 = vmul.u32.u64.high %v411_v14, %v406_v30, %v1215_v34 }
 0x1a8   : > { %vm575_vm13 = vcmp.eq.f32.partialorder (!%p748_p0), %v572_v3, inf  ;;  %vm577_vm0 = vcmp.eq.f32.partialorder (!%p748_p0), %v572_v3, 0.0  ;;  %v578_v18 = vand.u32 (!%p748_p0), 2147483648, %v572_v3  ;;  %vm582_vm7 = vcmp.gt.f32.partialorder (!%p748_p0), %v1206_v49, 0.0 }
 0x1a9   : > { %vm420_vm9 = vc.u32 (!%p748_p0), %v1213_v33, %v1215_v34  ;;  %v421_v37 = vadd.s32 (!%p748_p0), 1, %v1216_v35  ;;  %v419_v55 = vadd.s32 (!%p748_p0), %v1215_v34, %v1213_v33  ;;  %v591_v29 = vadd.f32 (!%p748_p0), 1.0, %v750_v48  ;;  %v595_v48 = vld [vmem:[#allocation2] sm:$0xff] (!%p748_p0) }
 0x1aa   : > { %vm586_vm8 = vcmp.lt.f32.partialorder (!%p748_p0), %v1206_v49, 0.0 }
 0x1b0   : > { %v868_v13 = vpop.eup (!%p748_p0), %867 }
 0x1b1   : > { %v574_v16 = vmul.f32 (!%p748_p0), %v868_v13, %v572_v3 }
 0x1b3   : > { %v576_v20 = vsel (!%p748_p0), %vm575_vm13, %v572_v3, %v574_v16 }
 0x1b4   : > { %v579_v26 = vsel (!%p748_p0), %vm577_vm0, %v578_v18, %v576_v20 }
 0x213   : > { %344 = sbr.rel (%p748_p0) target bundleno = 642 (0x282), region = 52 }
 0x216   : > { %v337_v39 = vpop.xlane.xlu1 %336 }
 0x217   : > { %v338_v40 = vadd.f32 %v337_v39, %v323_v38  ;;  %v422_v38 = vsel (!%p748_p0), %vm420_vm9, %v421_v37, %v1216_v35 }
 0x218   : > { %v423_v39 = vadd.s32 (!%p748_p0), %v422_v38, %v418_v36  ;;  %v592_v36 = vmul.f32 (!%p748_p0), 0.4, %v591_v29 }
 0x219   : > { %339 = vst.msk [vmem:[#allocation3] sm:$0xff] %vm312_vm1, %v338_v40 }
 0x21a   : > { %v424_v40 = vadd.s32 536870912, %v423_v39 }
 0x21c   : > { %v425_v41 = vshrl.u32 %v424_v40, 30 }
 0x21e   : > { %v426_v42 = vshll.u32 %v425_v41, 30  ;;  %v449_v5 = vsub.s32 4, %v425_v41 }
 0x220   : > { %v427_v43 = vsub.s32 %v423_v39, %v426_v42  ;;  %v450_v8 = vsel %vm365_vm11, %v449_v5, %v425_v41  ;;  %v597_v50 = vld [vmem:[#allocation3] sm:$0xff] }
 0x221   : > { %v452_v11 = vsel %vm364_vm12, 0, %v450_v8 }
 0x222   : > { %v429_v44 = vsub.s32 0, %v427_v43  ;;  %v559_v12 = vadd.s32 3, %v452_v11  ;;  %v456_v14 = vand.u32 3, %v452_v11 }
 0x224   : > { %v753_v46 = vmin.u32 %v429_v44, %v427_v43  ;;  %v560_v15 = vand.u32 3, %v559_v12  ;;  %vm461_vm14 = vcmp.eq.s32.totalorder %v456_v14, 2  ;;  %vm458_vm2 = vcmp.eq.s32.totalorder %v456_v14, 0 }
 0x225   : > { %vm457_vm4 = vcmp.lt.s32.totalorder %v456_v14, 2 }
 0x226   : > { %v431_v51 = vclz %v753_v46  ;;  %vm565_vm15 = vcmp.eq.s32.totalorder %v560_v15, 2  ;;  %vm562_vm3 = vcmp.eq.s32.totalorder %v560_v15, 0  ;;  %vm561_vm5 = vcmp.lt.s32.totalorder %v560_v15, 2 }
 0x228   : > { %v754_v53 = vadd.s32 4294967294, %v431_v51 }
 0x22a   : > { %vm755_vm10 = vcmp.lt.s32.totalorder %v754_v53, 0 }
 0x22b   : > { %v434_v56 = vsel %vm755_vm10, 0, %v754_v53 }
 0x22c   : > { %v435_v57 = vsub.s32 32, %v434_v56  ;;  %v436_v58 = vshll.u32 %v427_v43, %v434_v56  ;;  %v439_v59 = vsub.s32 4294967266, %v434_v56 }
 0x22e   : > { %v437_v60 = vshrl.u32 %v419_v55, %v435_v57  ;;  %v440_v61 = vadd.s32 127, %v439_v59 }
 0x230   : > { %v438_v63 = vor.u32 %v437_v60, %v436_v58  ;;  %v441_v0 = vshll.u32 %v440_v61, 23 }
 0x232   : > { %v442_v1 = vor.u32 4788187, %v441_v0  ;;  %v445_v2 = vcvt.s32.f32 %v438_v63 }
 0x234   : > { %v443_v4 = vand.u32 2147483647, %v442_v1 }
 0x236   : > { %v446_v6 = vmul.f32 %v445_v2, %v443_v4 }
 0x238   : > { %v447_v7 = vxor.u32 2147483648, %v446_v6 }
 0x23a   : > { %v448_v9 = vsel %vm365_vm11, %v447_v7, %v446_v6 }
 0x23b   : > { %v451_v10 = vsel %vm364_vm12, %v1206_v49, %v448_v9 }
 0x23c   : > { %869 = vcosq.f32 %v451_v10 }
 0x23d   : > { %871 = vsinq.f32 %v451_v10 }
 0x246   : > { %v870_v17 = vpop.eup %869 }
 0x247   : > { %v872_v52 = vpop.eup %871  ;;  %v462_v19 = vxor.u32 2147483648, %v870_v17 }
 0x248   : > { %v459_v21 = vxor.u32 2147483648, %v872_v52 }
 0x249   : > { %v463_v22 = vsel %vm461_vm14, %v462_v19, %v872_v52  ;;  %v567_v23 = vsel %vm565_vm15, %v462_v19, %v872_v52 }
 0x24a   : > { %v460_v24 = vsel %vm458_vm2, %v870_v17, %v459_v21  ;;  %v564_v25 = vsel %vm562_vm3, %v870_v17, %v459_v21 }
 0x24b   : > { %v464_v27 = vsel %vm457_vm4, %v460_v24, %v463_v22  ;;  %v568_v28 = vsel %vm561_vm5, %v564_v25, %v567_v23 }
 0x24c   : > { %v465_v30 = vsel %vm455_vm6, nan, %v464_v27  ;;  %v569_v31 = vsel %vm455_vm6, nan, %v568_v28 }
 0x24d   : > { %v570_v32 = vmul.f32 %v1224_v54, %v465_v30  ;;  %v580_v33 = vmul.f32 %v579_v26, %v569_v31  ;;  %vm583_vm9 = vcmp.gt.f32.partialorder %v1224_v54, %v465_v30  ;;  %v587_v34 = vsub.f32 0.0, %v465_v30 }
 0x24e   : > { %vm584_vm10 = vmand %vm582_vm7, %vm583_vm9 }
 0x24f   : > { %v581_v35 = vadd.f32 %v580_v33, %v570_v32  ;;  %vm588_vm11 = vcmp.lt.f32.partialorder %v1224_v54, %v587_v34 }
 0x250   : > { %vm589_vm12 = vmand %vm586_vm8, %vm588_vm11 }
 0x251   : > { %v585_v37 = vsel %vm584_vm10, 1.0, %v581_v35 }
 0x252   : > { %v590_v38 = vsel %vm589_vm12, -1.0, %v585_v37 }
 0x253   : > { %v593_v47 = vsub.f32 %v590_v38, %v592_v36 }
 0x255   : > { %v594_v39 = vmul.f32 64.0, %v593_v47 }
 0x257   : > { %v596_v40 = vmax.f32 %v595_v48, %v594_v39 }
 0x259   : > { %v598_v41 = vsub.f32 %v595_v48, %v596_v40  ;;  %v602_v49 = vsub.f32 %v1221_v45, %v596_v40  ;;  %v606_v42 = vsub.f32 %v594_v39, %v596_v40 }
 0x25b   : > { %v599_v43 = vmul.f32 1.442695, %v598_v41  ;;  %v603_v44 = vmul.f32 1.442695, %v602_v49  ;;  %v607_v46 = vmul.f32 1.442695, %v606_v42 }
 0x25d   : > { %873 = vpow2.f32 %v599_v43 }
 0x25e   : > { %875 = vpow2.f32 %v603_v44 }
 0x25f   : > { %877 = vpow2.f32 %v607_v46 }
 0x267   : > { %v874_v51 = vpop.eup %873 }
 0x268   : > { %v876_v53 = vpop.eup %875  ;;  %v601_v54 = vmul.f32 %v874_v51, %v597_v50 }
 0x269   : > { %v878_v55 = vpop.eup %877 }
 0x26a   : > { %v605_v56 = vsub.f32 %v601_v54, %v876_v53 }
 0x26c   : > { %v609_v57 = vadd.f32 %v878_v55, %v605_v56 }
 0x26e   : > { %v610_v58 = vmax.f32 %v609_v57, 1e-30 }
 0x270   : > { %879 = vlog2.f32 %v610_v58 }
 0x27a   : > { %v880_v59 = vpop.eup %879 }
 0x27b   : > { %v612_v60 = vmul.f32 0.6931472, %v880_v59 }
 0x27d   : > { %v613_v45 = vadd.f32 %v612_v60, %v596_v40 }
 0x27f   : > { %v614_v61 = vsub.f32 %v613_v45, %v594_v39 }
 0x281   : > { %615 = vst.msk [vmem:[%s278_s13] sm:$0xff] %vm312_vm1, %v614_v61 }
 0x282 PF: > { %s18_s22 = sadd.s32 1, %s996_s22   ;;  %s1295_s24 = sld [smem:[#allocation12_spill]] }
 0x283   : > { %p15_p6 = scmp.ge.s32.totalorder %s18_s22, 10   ;;  %s1296_s15 = smov %s972_s16 }
 0x284   : > { %s1297_s16 = smov %s976_s17  ;;  %s1298_s17 = smov %s1121_s5 }
 0x285   : > { %s1299_s18 = smov %s988_s20  ;;  %s1300_s19 = smov %s992_s21 }
 0x286   : > { %s1302_s21 = smov %s1308_s7  ;;  %17 = sbr.rel (!%p15_p6) target bundleno = 8 (0x8), region = 95 }
 0x288   : > { %s1301_s20 = smov %s1295_s24 }
 0x28d   :  { %635 = vsyncpa [#allocation6], 1 }
 0x28e   :  { %637 = vsyncpa [#allocation6 + $0x1], 1 }
 0x28f   :  { %638 = vsyncpa [#allocation7], 1 }
 0x290   :  { %640 = vsyncpa [#allocation7 + $0x1], 1 }

</bundles_post_ra>
